<compile_context>
chip_gen: v5e
topology: v5e:2x2
jax: 0.10.0
libtpu: 0.0.40
codegen_flags: <defaults>
</compile_context>

<pallas_src>
import jax
import jax.numpy as jnp
from jax.experimental import pallas as pl
from jax.experimental.pallas import tpu as pltpu

LANES = 128
_FAST_PATH_BYTES = 256 << 10      # below this, per-call overhead dominates
_MIN_MULTISTEP_BYTES = 2 << 20    # only force multi-step grids above this
_MIN_GRID_STEPS = 4               # >= 2 steps per v7x TensorCore
_BLOCK_BYTES_DEFAULT = 4 << 20    # per-buffer block size target


def _sublanes_for_dtype(dtype) -> int:
    """Packed sublane count per vreg: 8 for 4-byte, 16 for 2-byte, 32 for 1-byte."""
    itemsize = jnp.dtype(dtype).itemsize
    return max(8, 32 // max(itemsize, 1))


def _round_up(n: int, m: int) -> int:
    return ((n + m - 1) // m) * m


def _relu3_kernel(x_ref, o_ref):
    x = x_ref[...]
    zero = jnp.zeros((), dtype=x.dtype)
    three = jnp.full((), 3, dtype=x.dtype)
    o_ref[...] = jnp.minimum(jnp.maximum(x, zero), three)


def relu3(
    x: jax.Array,
    *,
    block_bytes: int = _BLOCK_BYTES_DEFAULT,
    force_pallas: bool = False,
    donate_input: bool = False,
) -> jax.Array:
    """Elementwise ReLU3 on an arbitrarily-shaped array (NCHW or otherwise)."""
    orig_shape = x.shape
    dtype = x.dtype
    total = x.size
    if total == 0:
        return x

    itemsize = jnp.dtype(dtype).itemsize
    total_bytes = total * itemsize

    # Fallbacks that avoid extra HBM passes:
    #  * non-128-multiple sizes would need a pad + slice round trip (up to
    #    ~3x HBM traffic) -> let XLA's fused elementwise clamp handle them.
    #  * tiny inputs are overhead-dominated -> single fused clamp is optimal.
    if (total % LANES != 0) or (total_bytes < _FAST_PATH_BYTES and not force_pallas):
        return jnp.minimum(jnp.maximum(x, jnp.zeros((), dtype)),
                           jnp.full((), 3, dtype))

    sub = _sublanes_for_dtype(dtype)
    rows = total // LANES

    # Rows per block from a BYTE budget so every dtype gets ~block_bytes blocks
    # (a fixed row count would under-tile bf16/int8). Align rows to the packed
    # sublane count so stores stay unmasked.
    tr_cap = max(sub, _round_up(max(block_bytes, LANES * itemsize) // (LANES * itemsize), sub))
    tr = min(tr_cap, _round_up(rows, sub))

    if total_bytes >= _MIN_MULTISTEP_BYTES:
        # Guarantee >= _MIN_GRID_STEPS steps (>= 2 per v7x TensorCore) and an
        # even step count, so both cores stay balanced and the read stream of
        # block i+1 overlaps the writeback of block i-1. Neutral overhead on
        # single-core v5e/v6e at these sizes; tiny inputs never reach here.
        steps = max(_MIN_GRID_STEPS, pl.cdiv(rows, tr_cap))
        steps += steps % 2
        tr = max(sub, _round_up(pl.cdiv(rows, steps), sub))

    grid = (pl.cdiv(rows, tr),)

    # VMEM budget: in + out, double-buffered = 4 x block. Pass an explicit
    # scoped-VMEM limit so large blocks work on v5e (16 MiB default) while
    # staying well under v7x's 64 MiB physical per-core VMEM.
    footprint = 4 * tr * LANES * itemsize
    vmem_limit = int(min(48 << 20, max(32 << 20, footprint + (8 << 20))))

    x2d = jnp.ravel(x).reshape(rows, LANES)  # free for contiguous arrays

    out2d = pl.pallas_call(
        _relu3_kernel,
        out_shape=jax.ShapeDtypeStruct((rows, LANES), dtype),
        grid=grid,
        in_specs=[pl.BlockSpec((tr, LANES), lambda i: (i, 0))],
        out_specs=pl.BlockSpec((tr, LANES), lambda i: (i, 0)),
        compiler_params=pltpu.CompilerParams(
            dimension_semantics=("parallel",),
            vmem_limit_bytes=vmem_limit,
        ),
        cost_estimate=pl.CostEstimate(
            flops=2 * total,
            transcendentals=0,
            bytes_accessed=2 * total * itemsize,
        ),
        input_output_aliases=({0: 0} if donate_input else {}),
    )(x2d)

    return out2d.reshape(orig_shape)


if __name__ == "__main__":
    key = jax.random.PRNGKey(0)
    # Small NCHW input consistent with the module's typical use.
    x = jax.random.normal(key, (2, 4, 16, 16), dtype=jnp.float32) * 4.0

    # force_pallas=True so the Pallas path (not the small-input fast path)
    # is exercised at this small test size.
    y = relu3(x, force_pallas=True)
    jax.block_until_ready(y)

    # Reference check in plain JAX.
    y_ref = jnp.minimum(jnp.maximum(x, 0.0), 3.0)
    assert y.shape == x.shape and y.dtype == x.dtype
    assert jnp.allclose(y, y_ref), "mismatch vs reference"

    # Also exercise the non-128-multiple fallback path for correctness.
    x2 = jax.random.normal(jax.random.PRNGKey(1), (3, 5, 7), dtype=jnp.float32) * 4.0
    y2 = relu3(x2)
    jax.block_until_ready(y2)
    assert jnp.allclose(y2, jnp.minimum(jnp.maximum(x2, 0.0), 3.0))

    print("KERNEL_OK")
</pallas_src>

<mosaic_0001>
module attributes {stable_mosaic.version = 11 : i64} {
  func.func @_relu3_kernel(%arg0: i32, %arg1: memref<16x128xf32, #tpu.memory_space<vmem>>, %arg2: memref<16x128xf32, #tpu.memory_space<vmem>>) attributes {dimension_semantics = [#tpu.dimension_semantics<parallel>], iteration_bounds = array<i64: 1>, scalar_prefetch = 0 : i64, scratch_operands = 0 : i64, tpu.core_type = #tpu.core_type<tc>, window_params = [{transform_indices = @transform_0, window_bounds = array<i64: 16, 128>}, {transform_indices = @transform_1, window_bounds = array<i64: 16, 128>}]} {
    %c0 = arith.constant 0 : index
    %c0_0 = arith.constant 0 : index
    %0 = vector.load %arg1[%c0, %c0_0] : memref<16x128xf32, #tpu.memory_space<vmem>>, vector<16x128xf32>
    %cst = arith.constant 0.000000e+00 : f32
    %1 = vector.broadcast %cst : f32 to vector<16x128xf32>
    %2 = arith.maximumf %0, %1 : vector<16x128xf32>
    %cst_1 = arith.constant 3.000000e+00 : f32
    %3 = vector.broadcast %cst_1 : f32 to vector<16x128xf32>
    %4 = arith.minimumf %2, %3 : vector<16x128xf32>
    %c0_2 = arith.constant 0 : index
    %c0_3 = arith.constant 0 : index
    %5 = vector.load %arg2[%c0_2, %c0_3] : memref<16x128xf32, #tpu.memory_space<vmem>>, vector<16x128xf32>
    tpu.vector_store %arg2[%c0_2, %c0_3], %4 {strides = array<i32>} : memref<16x128xf32, #tpu.memory_space<vmem>>, vector<16x128xf32>,
    return
  }
  func.func @transform_0(%arg0: i32) -> (i32, i32) {
    %c0_i32 = arith.constant 0 : i32
    %c0_i32_0 = arith.constant 0 : i32
    return %arg0, %c0_i32 : i32, i32
  }
  func.func @transform_1(%arg0: i32) -> (i32, i32) {
    %c0_i32 = arith.constant 0 : i32
    %c0_i32_0 = arith.constant 0 : i32
    return %arg0, %c0_i32 : i32, i32
  }
}

</mosaic_0001>

<bundles_post_ra>
// kernel: tpu_custom_call.1
= control target key start
LH: loop header
LB: loop body
LE: loop exit
PB: predicated region body
PF: predicated region fallthrough
CT: control target
= control target key end

     0   :  { %6 = vsyncpa [#allocation3], 0  ;;  %s128_s0 = inlined_call_operand.hbm [shape: f32[16,128], index: 0, kind: input, shape index: {}]   ;;  %s129_s1 = inlined_call_operand.hbm [shape: f32[16,128], index: 1, kind: output, shape index: {}]  }
   0x1   :  { %7 = vsyncpa [#allocation4], 0  ;;  %s12_s8 = sshll.u32 %s128_s0, 4  ;;  %s108_s9 = smov [#allocation2]   ;;  %s13_s8 = int_to_ptr.hbm [resolvable:$true] %s12_s8 }
   0x2   :  { %s14_s10 = sshll.u32 %s108_s9, 4  ;;  %s109_s11 = smov 128   ;;  %s15_s10 = int_to_ptr.vmem [resolvable:$true] %s14_s10 }
   0x3   :  { %s110_s12 = smov 8  }
   0x4   :  { %20 = dma.hbm_to_vmem [thread:$0]  %s13_s8, 256, %s15_s10, [#allocation3], %s109_s11, %s109_s11, %s110_s12  }
   0x5   :  { %104 = dma.done.wait [#allocation3], 256  }
   0x6   :  { %105 = vsyncadd [#allocation3], 4294967040  ;;  %v25_v0 = vld [vmem:[#allocation2] sm:$0xff]  ;;  %v26_v1 = vld [vmem:[#allocation2 + $0x8] sm:$0xff]  ;;  %s111_s13 = smov [#allocation5]   ;;  %s39_s17 = sshll.u32 %s129_s1, 4  ;;  %s40_s17 = int_to_ptr.hbm [resolvable:$true] %s39_s17 }
   0x7   :  { %v27_v2 = vmax.f32 %v25_v0, 0.0  ;;  %v28_v3 = vmax.f32 %v26_v1, 0.0  ;;  %s37_s14 = sshll.u32 %s111_s13, 4  ;;  %s38_s14 = int_to_ptr.vmem [resolvable:$true] %s37_s14 }
   0x9   :  { %v29_v4 = vmin.f32 %v27_v2, 3.0  ;;  %v30_v5 = vmin.f32 %v28_v3, 3.0 }
   0xb   :  { %31 = vst [vmem:[#allocation5] sm:$0xff] %v29_v4 }
   0xc   :  { %32 = vst [vmem:[#allocation5 + $0x8] sm:$0xff] %v30_v5 }
   0xd   :  { %45 = dma.vmem_to_hbm [thread:$0]  %s38_s14, 256, %s40_s17, [#allocation4], %s109_s11, %s109_s11, %s110_s12  }
   0xe   :  { %106 = dma.done.wait [#allocation4], 256  }
   0xf   :  { %107 = vsyncadd [#allocation4], 4294967040 }
  0x10   :  { %50 = vsyncpa [#allocation3], 1 }
  0x11   :  { %51 = vsyncpa [#allocation4], 1 }

</bundles_post_ra>
